<compile_context>
chip_gen: v7x
topology: tpu7x:2x2x1
jax: 0.10.0
libtpu: 0.0.40
codegen_flags: <defaults>
</compile_context>

<pallas_src>
import functools

import jax
import jax.numpy as jnp
from jax.experimental import pallas as pl
from jax.experimental.pallas import tpu as pltpu

_EPS = 1e-5
_LEAK = 0.2
# Use the batch-folded (C_out, N*P) layout when the whole batch fits in one
# lane slab (deep UNet layers with small spatial outputs).
_FOLD_MAX_LANES = 4096


# ---------------------------------------------------------------------------
# In-kernel epilogue: InstanceNorm2d (affine=False, eps=1e-5, biased variance)
# followed by LeakyReLU(0.2).
# ---------------------------------------------------------------------------
def _instnorm_lrelu(y):
    """Stats over the last (spatial) axis of a (channels, spatial) f32 slab."""
    mean = jnp.mean(y, axis=1, keepdims=True)
    cent = y - mean
    var = jnp.mean(cent * cent, axis=1, keepdims=True)
    y = cent * jax.lax.rsqrt(var + _EPS)
    return jnp.where(y > 0, y, _LEAK * y)


def _instnorm_lrelu_folded(y, n, p):
    """Lanes hold `n` batch segments of length `p`: per-(channel, batch)
    stats via masked reductions (no in-kernel reshape)."""
    if n == 1:
        return _instnorm_lrelu(y)
    lanes = y.shape[1]
    cols = jax.lax.broadcasted_iota(jnp.int32, (1, lanes), 1)
    out = y
    inv_p = 1.0 / p
    for b in range(n):  # n is small on the folded path
        m = (cols >= b * p) & (cols < (b + 1) * p)
        mean = jnp.sum(jnp.where(m, y, 0.0), axis=1, keepdims=True) * inv_p
        cent = y - mean
        var = jnp.sum(jnp.where(m, cent * cent, 0.0), axis=1, keepdims=True) * inv_p
        out = jnp.where(m, cent * jax.lax.rsqrt(var + _EPS), out)
    return jnp.where(out > 0, out, _LEAK * out)


# ---------------------------------------------------------------------------
# Kernels.  Per-batch path: blocks (1, tk, P)/(tc, tk) -> (1, tc, P).
#           Folded path   : blocks (tk, N*P)/(tc, tk) -> (tc, N*P).
# ---------------------------------------------------------------------------
def _kernel_batched_noacc(patch_ref, w_ref, o_ref):
    # Whole reduction in one tile: no accumulator RMW, write straight out.
    y = jnp.dot(w_ref[...], patch_ref[0], preferred_element_type=jnp.float32)
    o_ref[0] = _instnorm_lrelu(y).astype(o_ref.dtype)


def _kernel_batched_acc(patch_ref, w_ref, o_ref, acc_ref):
    k = pl.program_id(2)

    @pl.when(k == 0)
    def _():
        acc_ref[...] = jnp.zeros_like(acc_ref)

    acc_ref[...] += jnp.dot(w_ref[...], patch_ref[0],
                            preferred_element_type=jnp.float32)

    @pl.when(k == pl.num_programs(2) - 1)
    def _():
        o_ref[0] = _instnorm_lrelu(acc_ref[...]).astype(o_ref.dtype)


def _kernel_folded_noacc(patch_ref, w_ref, o_ref, *, n, p):
    y = jnp.dot(w_ref[...], patch_ref[...], preferred_element_type=jnp.float32)
    o_ref[...] = _instnorm_lrelu_folded(y, n, p).astype(o_ref.dtype)


def _kernel_folded_acc(patch_ref, w_ref, o_ref, acc_ref, *, n, p):
    k = pl.program_id(1)

    @pl.when(k == 0)
    def _():
        acc_ref[...] = jnp.zeros_like(acc_ref)

    acc_ref[...] += jnp.dot(w_ref[...], patch_ref[...],
                            preferred_element_type=jnp.float32)

    @pl.when(k == pl.num_programs(1) - 1)
    def _():
        o_ref[...] = _instnorm_lrelu_folded(acc_ref[...], n, p).astype(o_ref.dtype)


# ---------------------------------------------------------------------------
# im2col producers (K flattened in (C, kh, kw) order, matching
# weight.reshape(C_out, C_in*kh*kw)).
# TODO(synk): replace with in-kernel patch extraction to drop this HBM
#             intermediate on the bandwidth-bound early layers.
# ---------------------------------------------------------------------------
def _im2col_batched(x, kh, kw, stride, pad):
    """(N, C, H, W) -> patches (N, K, P), P in (oh, ow) order."""
    n, c, h, w = x.shape
    xp = jnp.pad(x, ((0, 0), (0, 0), (pad, pad), (pad, pad)))
    oh = (h + 2 * pad - kh) // stride + 1
    ow = (w + 2 * pad - kw) // stride + 1
    cols = [xp[:, :, i:i + stride * oh:stride, j:j + stride * ow:stride]
            for i in range(kh) for j in range(kw)]
    p = jnp.stack(cols, axis=2)                   # (N, C, kh*kw, oh, ow)
    return p.reshape(n, c * kh * kw, oh * ow), oh, ow


def _im2col_folded(x, kh, kw, stride, pad):
    """(N, C, H, W) -> patches (K, N*P), lanes in (N, oh, ow) order."""
    n, c, h, w = x.shape
    xp = jnp.pad(x, ((0, 0), (0, 0), (pad, pad), (pad, pad)))
    xp = jnp.transpose(xp, (1, 0, 2, 3))          # (C, N, Hp, Wp) -- small here
    oh = (h + 2 * pad - kh) // stride + 1
    ow = (w + 2 * pad - kw) // stride + 1
    cols = [xp[:, :, i:i + stride * oh:stride, j:j + stride * ow:stride]
            for i in range(kh) for j in range(kw)]
    p = jnp.stack(cols, axis=1)                   # (C, kh*kw, N, oh, ow)
    return p.reshape(c * kh * kw, n * oh * ow), oh, ow


# ---------------------------------------------------------------------------
# VMEM budget + tile selection.
# ---------------------------------------------------------------------------
def _vmem_plan():
    """Return (vmem_limit_bytes, tile_budget_bytes, device_kind)."""
    phys = None
    try:
        phys = int(pltpu.get_tpu_info().vmem_capacity_bytes)
    except Exception:
        phys = None
    kind = ""
    try:
        kind = jax.devices()[0].device_kind.lower()
    except Exception:
        pass
    if phys is None or phys <= 0:
        phys = (128 * 1024 * 1024 if ("v5" in kind or "v6" in kind)
                else 64 * 1024 * 1024)            # v7x / unknown: conservative
    vmem_limit = (phys * 3) // 4                  # headroom for Mosaic scratch
    tile_budget = (phys * 9) // 16                # what the tile picker plans to
    return int(vmem_limit), int(tile_budget), kind


def _pick_tiles(K, C_out, lanes, out_itemsize, n_batch, budget_bytes):
    """Choose (tk, tc, K_pad, C_pad) such that the per-step VMEM footprint
    (double-buffered patch/weight/output blocks + f32 accumulator when the
    reduction is tiled) fits `budget_bytes`, minimizing estimated HBM traffic
    (patches re-streamed nc times, weight re-streamed n_batch times)."""

    def tk_candidates():
        cands = []
        if K <= 2048:
            cands.append(K)                       # nk == 1 fast path
        for t in range(2048, 127, -128):          # aligned divisors of K
            if t < K and K % t == 0:
                cands.append(t)
        for t in (2048, 1024, 512, 256, 128):     # generic (K zero-padded)
            if t < K:
                cands.append(t)
        seen, out = set(), []
        for t in cands:
            if t not in seen:
                seen.add(t)
                out.append(t)
        return out

    def tc_candidates():
        cands = []
        if C_out <= 512:
            cands.append(C_out)
        for c in (512, 384, 256, 192, 128, 96, 64, 48, 32, 16, 8):
            if c < C_out:
                cands.append(c)
        return cands

    best = None
    for tk in tk_candidates():
        k_pad = -(-K // tk) * tk
        nk = k_pad // tk
        for tc in tc_candidates():
            c_pad = -(-C_out // tc) * tc
            nc = c_pad // tc
            vmem = (2 * tk * lanes * 2            # double-buffered bf16 patches
                    + 2 * tc * tk * 2             # double-buffered bf16 weight
                    + 2 * tc * lanes * out_itemsize
                    + (tc * lanes * 4 if nk > 1 else 0))
            if vmem > budget_bytes:
                continue
            hbm = (nc * n_batch * k_pad * lanes * 2
                   + n_batch * c_pad * k_pad * 2)
            rmw = (nk - 1) * 2 * c_pad * lanes    # discounted f32 VMEM RMW
            score = hbm + n_batch * (rmw + nk * nc * 4096)
            cand = (score, -tk, -tc)
            if best is None or cand < best[0]:
                best = (cand, tk, tc, k_pad, c_pad)
    if best is None:
        # Spatial extent too large for any tile to fit the budget.
        # TODO(synk): tile the spatial axis with a two-pass InstanceNorm.
        tk = K if K <= 128 else 128
        tc = C_out if C_out <= 8 else 8
        return tk, tc, -(-K // tk) * tk, -(-C_out // tc) * tc
    return best[1], best[2], best[3], best[4]


# ---------------------------------------------------------------------------
# Wrapper.
# ---------------------------------------------------------------------------
@functools.partial(jax.jit, static_argnames=("normalize",))
def unet_down(x_nchw, weight, normalize=True):
    """x_nchw: (N, C_in, H, W); weight: (C_out, C_in, 4, 4) (PyTorch layout).

    Returns (N, C_out, H//2, W//2).
    """
    assert normalize, "only the normalize=True path is implemented"  # TODO(synk)
    N, C_in, H, W = x_nchw.shape
    C_out, _, kh, kw = weight.shape
    out_dtype = x_nchw.dtype
    out_isz = jnp.dtype(out_dtype).itemsize

    K = C_in * kh * kw
    xb = x_nchw.astype(jnp.bfloat16)
    wb = weight.astype(jnp.bfloat16).reshape(C_out, K)

    vmem_limit, tile_budget, kind = _vmem_plan()
    is_v7 = "v7" in kind

    oh_est = (H + 2 - kh) // 2 + 1
    ow_est = (W + 2 - kw) // 2 + 1
    folded = (N * oh_est * ow_est) <= _FOLD_MAX_LANES

    if folded:
        # ---------------- batch-folded path: out (C_out, N*P) ----------------
        patches, oh, ow = _im2col_folded(xb, kh, kw, 2, 1)       # (K, L) bf16
        P = oh * ow
        L = N * P

        tk, tc, K_pad, C_pad = _pick_tiles(K, C_out, L, out_isz, 1, tile_budget)
        if is_v7 and (C_pad // tc) < 2 and tc >= 32 and (tc // 2) % 8 == 0:
            tc //= 2                      # give both v7x TensorCores a C tile
            C_pad = -(-C_out // tc) * tc
        nk, nc = K_pad // tk, C_pad // tc

        w_mat = wb
        if K_pad > K:
            patches = jnp.pad(patches, ((0, K_pad - K), (0, 0)))
            w_mat = jnp.pad(w_mat, ((0, 0), (0, K_pad - K)))
        if C_pad > C_out:
            w_mat = jnp.pad(w_mat, ((0, C_pad - C_out), (0, 0)))

        if nk == 1:
            kernel = functools.partial(_kernel_folded_noacc, n=N, p=P)
            scratch = []
        else:
            kernel = functools.partial(_kernel_folded_acc, n=N, p=P)
            scratch = [pltpu.VMEM((tc, L), jnp.float32)]

        cost = pl.CostEstimate(
            flops=2 * C_pad * K_pad * L,
            transcendentals=0,
            bytes_accessed=(nc * K_pad * L * 2 + C_pad * K_pad * 2
                            + C_pad * L * out_isz))

        out = pl.pallas_call(
            kernel,
            out_shape=jax.ShapeDtypeStruct((C_pad, L), out_dtype),
            grid_spec=pltpu.PrefetchScalarGridSpec(
                num_scalar_prefetch=0,
                grid=(nc, nk),
                in_specs=[
                    pl.BlockSpec((tk, L), lambda c, k: (k, 0)),
                    pl.BlockSpec((tc, tk), lambda c, k: (c, k)),
                ],
                out_specs=pl.BlockSpec((tc, L), lambda c, k: (c, 0)),
                scratch_shapes=scratch),
            compiler_params=pltpu.CompilerParams(
                dimension_semantics=("parallel", "arbitrary"),
                vmem_limit_bytes=vmem_limit,
                allow_input_fusion=[True, False]),
            cost_estimate=cost,
        )(patches, w_mat)

        out = out[:C_out].reshape(C_out, N, oh, ow)
        return jnp.transpose(out, (1, 0, 2, 3))

    else:
        # ---------------- per-batch path: out (N, C_out, P) ------------------
        patches, oh, ow = _im2col_batched(xb, kh, kw, 2, 1)      # (N, K, P)
        P = oh * ow

        tk, tc, K_pad, C_pad = _pick_tiles(K, C_out, P, out_isz, N, tile_budget)
        if is_v7 and N * (C_pad // tc) < 2 and tc >= 32 and (tc // 2) % 8 == 0:
            tc //= 2
            C_pad = -(-C_out // tc) * tc
        nk, nc = K_pad // tk, C_pad // tc

        w_mat = wb
        if K_pad > K:
            patches = jnp.pad(patches, ((0, 0), (0, K_pad - K), (0, 0)))
            w_mat = jnp.pad(w_mat, ((0, 0), (0, K_pad - K)))
        if C_pad > C_out:
            w_mat = jnp.pad(w_mat, ((0, C_pad - C_out), (0, 0)))

        if nk == 1:
            kernel = _kernel_batched_noacc
            scratch = []
        else:
            kernel = _kernel_batched_acc
            scratch = [pltpu.VMEM((tc, P), jnp.float32)]

        cost = pl.CostEstimate(
            flops=2 * N * C_pad * K_pad * P,
            transcendentals=0,
            bytes_accessed=(nc * N * K_pad * P * 2 + N * C_pad * K_pad * 2
                            + N * C_pad * P * out_isz))

        out = pl.pallas_call(
            kernel,
            out_shape=jax.ShapeDtypeStruct((N, C_pad, P), out_dtype),
            grid_spec=pltpu.PrefetchScalarGridSpec(
                num_scalar_prefetch=0,
                grid=(N, nc, nk),
                in_specs=[
                    pl.BlockSpec((1, tk, P), lambda n, c, k: (n, k, 0)),
                    pl.BlockSpec((tc, tk), lambda n, c, k: (c, k)),
                ],
                out_specs=pl.BlockSpec((1, tc, P), lambda n, c, k: (n, c, 0)),
                scratch_shapes=scratch),
            compiler_params=pltpu.CompilerParams(
                dimension_semantics=("parallel", "parallel", "arbitrary"),
                vmem_limit_bytes=vmem_limit,
                allow_input_fusion=[True, False]),
            cost_estimate=cost,
        )(patches, w_mat)

        out = out[:, :C_out]                                     # (N, C_out, P)
        return out.reshape(N, C_out, oh, ow)


# ---------------------------------------------------------------------------
# Pure-JAX reference (fed the same bf16-rounded operands the kernel sees).
# ---------------------------------------------------------------------------
def _reference(x_nchw, weight):
    xf = x_nchw.astype(jnp.bfloat16).astype(jnp.float32)
    wf = weight.astype(jnp.bfloat16).astype(jnp.float32)
    y = jax.lax.conv_general_dilated(
        xf, wf, window_strides=(2, 2), padding=((1, 1), (1, 1)),
        dimension_numbers=("NCHW", "OIHW", "NCHW"),
        preferred_element_type=jnp.float32,
    )
    mean = jnp.mean(y, axis=(2, 3), keepdims=True)
    var = jnp.mean((y - mean) ** 2, axis=(2, 3), keepdims=True)
    y = (y - mean) * jax.lax.rsqrt(var + _EPS)
    return jnp.where(y > 0, y, _LEAK * y)


if __name__ == "__main__":
    key = jax.random.PRNGKey(0)

    def _run_case(idx, n, c_in, h, w, c_out):
        kx, kw_ = jax.random.split(jax.random.fold_in(key, idx))
        x = jax.random.normal(kx, (n, c_in, h, w), dtype=jnp.float32)
        wt = jax.random.normal(kw_, (c_out, c_in, 4, 4), dtype=jnp.float32) * 0.1
        out = jax.block_until_ready(unet_down(x, wt))
        ref = jax.block_until_ready(_reference(x, wt))
        assert out.shape == (n, c_out, h // 2, w // 2), out.shape
        err = float(jnp.max(jnp.abs(out - ref)))
        assert jnp.allclose(out, ref, atol=2e-3, rtol=2e-3), (idx, err)

    # Primary small shape (batch-folded, single-K-tile fast path).
    _run_case(0, 2, 4, 16, 16, 8)
    # Larger spatial output -> per-batch (lane = P) path.
    _run_case(1, 2, 4, 128, 128, 8)
    # Large K -> tiled reduction with persistent f32 accumulator.
    _run_case(2, 2, 192, 16, 16, 16)

    print("KERNEL_OK")
</pallas_src>

<mosaic_0001>
module attributes {stable_mosaic.version = 11 : i64} {
  func.func @_kernel_folded_noacc(%arg0: i32, %arg1: i32, %arg2: memref<64x128xbf16, #tpu.memory_space<vmem>>, %arg3: memref<8x64xbf16, #tpu.memory_space<vmem>>, %arg4: memref<8x128xf32, #tpu.memory_space<vmem>>) attributes {dimension_semantics = [#tpu.dimension_semantics<parallel>, #tpu.dimension_semantics<arbitrary>], iteration_bounds = array<i64: 1, 1>, scalar_prefetch = 0 : i64, scratch_operands = 0 : i64, tpu.core_type = #tpu.core_type<tc>, window_params = [{transform_indices = @transform_0, window_bounds = array<i64: 64, 128>}, {transform_indices = @transform_1, window_bounds = array<i64: 8, 64>}, {transform_indices = @transform_2, window_bounds = array<i64: 8, 128>}]} {
    %c0 = arith.constant 0 : index
    %c0_0 = arith.constant 0 : index
    %0 = vector.load %arg3[%c0, %c0_0] : memref<8x64xbf16, #tpu.memory_space<vmem>>, vector<8x64xbf16>
    %c0_1 = arith.constant 0 : index
    %c0_2 = arith.constant 0 : index
    %1 = vector.load %arg2[%c0_1, %c0_2] : memref<64x128xbf16, #tpu.memory_space<vmem>>, vector<64x128xbf16>
    %cst = arith.constant dense<0.000000e+00> : vector<8x128xf32>
    %2 = tpu.matmul %0, %1, %cst {dimension_numbers = #tpu.dot_dimension_numbers<[1], [0], [0], [1], [0, 0, 1, 1], [], []>} : vector<8x64xbf16>, vector<64x128xbf16>, vector<8x128xf32> -> vector<8x128xf32>
    %3 = tpu.iota {dimensions = array<i32: 1>} : vector<1x128xi32>
    %c0_i32 = arith.constant 0 : i32
    %4 = vector.broadcast %c0_i32 : i32 to vector<1x128xi32>
    %5 = arith.cmpi sge, %3, %4 : vector<1x128xi32>
    %c64_i32 = arith.constant 64 : i32
    %6 = vector.broadcast %c64_i32 : i32 to vector<1x128xi32>
    %7 = arith.cmpi slt, %3, %6 : vector<1x128xi32>
    %8 = arith.andi %5, %7 : vector<1x128xi1>
    %cst_3 = arith.constant 0.000000e+00 : f32
    %9 = vector.shape_cast %8 : vector<1x128xi1> to vector<1x128xi1>
    %10 = vector.broadcast %9 : vector<1x128xi1> to vector<8x128xi1>
    %11 = vector.broadcast %cst_3 : f32 to vector<8x128xf32>
    %12 = arith.select %10, %2, %11 : vector<8x128xi1>, vector<8x128xf32>
    %cst_4 = arith.constant dense<0.000000e+00> : vector<8xf32>
    %13 = vector.multi_reduction <add>, %12, %cst_4 [1] : vector<8x128xf32> to vector<8xf32>
    %14 = vector.shape_cast %13 : vector<8xf32> to vector<8x1xf32>
    %cst_5 = arith.constant 1.562500e-02 : f32
    %15 = vector.broadcast %cst_5 : f32 to vector<8x1xf32>
    %16 = arith.mulf %14, %15 : vector<8x1xf32>
    %17 = vector.broadcast %16 : vector<8x1xf32> to vector<8x128xf32>
    %18 = arith.subf %2, %17 : vector<8x128xf32>
    %19 = arith.mulf %18, %18 : vector<8x128xf32>
    %cst_6 = arith.constant 0.000000e+00 : f32
    %20 = vector.shape_cast %8 : vector<1x128xi1> to vector<1x128xi1>
    %21 = vector.broadcast %20 : vector<1x128xi1> to vector<8x128xi1>
    %22 = vector.broadcast %cst_6 : f32 to vector<8x128xf32>
    %23 = arith.select %21, %19, %22 : vector<8x128xi1>, vector<8x128xf32>
    %cst_7 = arith.constant dense<0.000000e+00> : vector<8xf32>
    %24 = vector.multi_reduction <add>, %23, %cst_7 [1] : vector<8x128xf32> to vector<8xf32>
    %25 = vector.shape_cast %24 : vector<8xf32> to vector<8x1xf32>
    %cst_8 = arith.constant 1.562500e-02 : f32
    %26 = vector.broadcast %cst_8 : f32 to vector<8x1xf32>
    %27 = arith.mulf %25, %26 : vector<8x1xf32>
    %cst_9 = arith.constant 9.99999974E-6 : f32
    %28 = vector.broadcast %cst_9 : f32 to vector<8x1xf32>
    %29 = arith.addf %27, %28 : vector<8x1xf32>
    %30 = math.rsqrt %29 : vector<8x1xf32>
    %31 = vector.broadcast %30 : vector<8x1xf32> to vector<8x128xf32>
    %32 = arith.mulf %18, %31 : vector<8x128xf32>
    %33 = vector.shape_cast %8 : vector<1x128xi1> to vector<1x128xi1>
    %34 = vector.broadcast %33 : vector<1x128xi1> to vector<8x128xi1>
    %35 = arith.select %34, %32, %2 : vector<8x128xi1>, vector<8x128xf32>
    %c64_i32_10 = arith.constant 64 : i32
    %36 = vector.broadcast %c64_i32_10 : i32 to vector<1x128xi32>
    %37 = arith.cmpi sge, %3, %36 : vector<1x128xi32>
    %c128_i32 = arith.constant 128 : i32
    %38 = vector.broadcast %c128_i32 : i32 to vector<1x128xi32>
    %39 = arith.cmpi slt, %3, %38 : vector<1x128xi32>
    %40 = arith.andi %37, %39 : vector<1x128xi1>
    %cst_11 = arith.constant 0.000000e+00 : f32
    %41 = vector.shape_cast %40 : vector<1x128xi1> to vector<1x128xi1>
    %42 = vector.broadcast %41 : vector<1x128xi1> to vector<8x128xi1>
    %43 = vector.broadcast %cst_11 : f32 to vector<8x128xf32>
    %44 = arith.select %42, %2, %43 : vector<8x128xi1>, vector<8x128xf32>
    %cst_12 = arith.constant dense<0.000000e+00> : vector<8xf32>
    %45 = vector.multi_reduction <add>, %44, %cst_12 [1] : vector<8x128xf32> to vector<8xf32>
    %46 = vector.shape_cast %45 : vector<8xf32> to vector<8x1xf32>
    %cst_13 = arith.constant 1.562500e-02 : f32
    %47 = vector.broadcast %cst_13 : f32 to vector<8x1xf32>
    %48 = arith.mulf %46, %47 : vector<8x1xf32>
    %49 = vector.broadcast %48 : vector<8x1xf32> to vector<8x128xf32>
    %50 = arith.subf %2, %49 : vector<8x128xf32>
    %51 = arith.mulf %50, %50 : vector<8x128xf32>
    %cst_14 = arith.constant 0.000000e+00 : f32
    %52 = vector.shape_cast %40 : vector<1x128xi1> to vector<1x128xi1>
    %53 = vector.broadcast %52 : vector<1x128xi1> to vector<8x128xi1>
    %54 = vector.broadcast %cst_14 : f32 to vector<8x128xf32>
    %55 = arith.select %53, %51, %54 : vector<8x128xi1>, vector<8x128xf32>
    %cst_15 = arith.constant dense<0.000000e+00> : vector<8xf32>
    %56 = vector.multi_reduction <add>, %55, %cst_15 [1] : vector<8x128xf32> to vector<8xf32>
    %57 = vector.shape_cast %56 : vector<8xf32> to vector<8x1xf32>
    %cst_16 = arith.constant 1.562500e-02 : f32
    %58 = vector.broadcast %cst_16 : f32 to vector<8x1xf32>
    %59 = arith.mulf %57, %58 : vector<8x1xf32>
    %cst_17 = arith.constant 9.99999974E-6 : f32
    %60 = vector.broadcast %cst_17 : f32 to vector<8x1xf32>
    %61 = arith.addf %59, %60 : vector<8x1xf32>
    %62 = math.rsqrt %61 : vector<8x1xf32>
    %63 = vector.broadcast %62 : vector<8x1xf32> to vector<8x128xf32>
    %64 = arith.mulf %50, %63 : vector<8x128xf32>
    %65 = vector.shape_cast %40 : vector<1x128xi1> to vector<1x128xi1>
    %66 = vector.broadcast %65 : vector<1x128xi1> to vector<8x128xi1>
    %67 = arith.select %66, %64, %35 : vector<8x128xi1>, vector<8x128xf32>
    %cst_18 = arith.constant 0.000000e+00 : f32
    %68 = vector.broadcast %cst_18 : f32 to vector<8x128xf32>
    %69 = arith.cmpf ogt, %67, %68 : vector<8x128xf32>
    %cst_19 = arith.constant 2.000000e-01 : f32
    %70 = vector.broadcast %cst_19 : f32 to vector<8x128xf32>
    %71 = arith.mulf %70, %67 : vector<8x128xf32>
    %72 = arith.select %69, %67, %71 : vector<8x128xi1>, vector<8x128xf32>
    %c0_20 = arith.constant 0 : index
    %c0_21 = arith.constant 0 : index
    %73 = vector.load %arg4[%c0_20, %c0_21] : memref<8x128xf32, #tpu.memory_space<vmem>>, vector<8x128xf32>
    tpu.vector_store %arg4[%c0_20, %c0_21], %72 {strides = array<i32>} : memref<8x128xf32, #tpu.memory_space<vmem>>, vector<8x128xf32>,
    return
  }
  func.func @transform_0(%arg0: i32, %arg1: i32) -> (i32, i32) {
    %c0_i32 = arith.constant 0 : i32
    %c0_i32_0 = arith.constant 0 : i32
    return %arg1, %c0_i32 : i32, i32
  }
  func.func @transform_1(%arg0: i32, %arg1: i32) -> (i32, i32) {
    %c0_i32 = arith.constant 0 : i32
    return %arg0, %arg1 : i32, i32
  }
  func.func @transform_2(%arg0: i32, %arg1: i32) -> (i32, i32) {
    %c0_i32 = arith.constant 0 : i32
    %c0_i32_0 = arith.constant 0 : i32
    return %arg0, %c0_i32 : i32, i32
  }
}

</mosaic_0001>

<bundles_post_ra>
// kernel: unet_down.1
= control target key start
LH: loop header
LB: loop body
LE: loop exit
PB: predicated region body
PF: predicated region fallthrough
CT: control target
= control target key end

     0   :  { %v169_v0 = vmov 0.0   ;;  %vm170_vm0 = vmmov 0   ;;  %vm45_vm1 = vcmask 523264   ;;  %v89_v6 = vlaneseq  ;;  %s210_s0 = inlined_call_operand.vmem [shape: bf16[64,128], index: 0, kind: input, shape index: {}]   ;;  %s211_s1 = inlined_call_operand.vmem [shape: bf16[8,64], index: 1, kind: input, shape index: {}]   ;;  %s212_s2 = inlined_call_operand.vmem [shape: f32[8,128], index: 2, kind: output, shape index: {}]  }
   0x1   :  { %147 = vmatprep.subr.bf16.mxu0 %v169_v0  ;;  %v161_v1 = vld [vmem:[%s210_s0] sm:$0xff]   ;;  %155 = vmatprep.mubr.msk.bf16.mxu0 %vm170_vm0, %v169_v0  ;;  %v162_v2 = vld [vmem:[%s210_s0 + $0x8] sm:$0xff]   ;;  %v163_v3 = vld [vmem:[%s210_s0 + $0x10] sm:$0xff]  }
   0x2   :  { %148 = vmatpush3.bf16.msra.mxu0 %v161_v1  ;;  %v164_v4 = vld [vmem:[%s210_s0 + $0x18] sm:$0xff]   ;;  %v12_v5 = vld [vmem:[%s211_s1] sm:$0xf]  ;;  %v90_v7 = vand.u32 127, %v89_v6 }
   0x3   :  { %149 = vmatprep.subr.bf16.mxu0 %v169_v0 }
   0x4   :  { %vm92_vm2 = vcmp.lt.s32.totalorder %v90_v7, 64  ;;  %vm110_vm3 = vcmp.ge.s32.totalorder %v90_v7, 64 }
   0x6   :  { %150 = vmatpush3.bf16.msra.mxu0 %v162_v2 }
   0x7   :  { %151 = vmatprep.subr.bf16.mxu0 %v169_v0 }
   0xa   :  { %152 = vmatpush3.bf16.msra.mxu0 %v163_v3 }
   0xb   :  { %153 = vmatprep.subr.bf16.mxu0 %v169_v0 }
   0xe   :  { %154 = vmatpush3.bf16.msra.mxu0 %v164_v4 }
  0x11   :  { %156 = vmatmul.mubr.msk.bf16.vlgmr.msra.gmra.mrb[0].mxu0 %vm45_vm1, %v12_v5 }
  0xe4   :  { %v83_v8 = vpop.f32.mrb[0].mxu0 }
  0xe5   :  { %v157_v9 = vpop.f32.mrb[1].mxu0  ;;  %v96_v10 = vsel %vm92_vm2, %v83_v8, 0.0  ;;  %v115_v13 = vsel %vm110_vm3, %v83_v8, 0.0 }
  0xe6   :  { %97 = vadd.xlane.f32.xlu0 %v96_v10  ;;  %v86_v11 = vpop.f32.mrb[2].mxu0 }
  0xe7   :  { %v158_v12 = vpop.f32.mrb[3].mxu0 }
  0xea   :  { %116 = vadd.xlane.f32.xlu0 %v115_v13 }
 0x173   :  { %v98_v14 = vpop.xlane.xlu0 %97 }
 0x174   :  { %v99_v15 = vmul.f32 0.015625, %v98_v14 }
 0x176   :  { %v100_v16 = vsub.f32 %v83_v8, %v99_v15 }
 0x177   :  { %v117_v17 = vpop.xlane.xlu0 %116 }
 0x178   :  { %v118_v18 = vmul.f32 0.015625, %v117_v17  ;;  %v101_v19 = vmul.f32 %v100_v16, %v100_v16 }
 0x17a   :  { %v119_v20 = vsub.f32 %v83_v8, %v118_v18  ;;  %v102_v21 = vsel %vm92_vm2, %v101_v19, 0.0 }
 0x17b   :  { %103 = vadd.xlane.f32.xlu1 %v102_v21 }
 0x17c   :  { %v120_v22 = vmul.f32 %v119_v20, %v119_v20 }
 0x17e   :  { %v121_v23 = vsel %vm110_vm3, %v120_v22, 0.0 }
 0x17f   :  { %122 = vadd.xlane.f32.xlu1 %v121_v23 }
 0x208   :  { %v104_v24 = vpop.xlane.xlu1 %103 }
 0x209   :  { %v105_v25 = vmul.f32 0.015625, %v104_v24 }
 0x20b   :  { %v106_v26 = vadd.f32 1e-05, %v105_v25 }
 0x20c   :  { %v123_v27 = vpop.xlane.xlu1 %122 }
 0x20d   :  { %165 = vrsqrt.f32 %v106_v26  ;;  %v124_v28 = vmul.f32 0.015625, %v123_v27 }
 0x20f   :  { %v125_v29 = vadd.f32 1e-05, %v124_v28 }
 0x211   :  { %167 = vrsqrt.f32 %v125_v29 }
 0x217   :  { %v166_v30 = vpop.eup %165 }
 0x218   :  { %v108_v31 = vmul.f32 %v166_v30, %v100_v16 }
 0x21a   :  { %v109_v34 = vsel %vm92_vm2, %v108_v31, %v83_v8 }
 0x21b   :  { %v168_v32 = vpop.eup %167 }
 0x21c   :  { %v127_v33 = vmul.f32 %v168_v32, %v119_v20 }
 0x21e   :  { %v128_v35 = vsel %vm110_vm3, %v127_v33, %v109_v34 }
 0x21f   :  { %vm129_vm4 = vcmp.gt.f32.partialorder %v128_v35, 0.0  ;;  %v130_v36 = vmul.f32 0.2, %v128_v35 }
 0x221   :  { %v131_v37 = vsel %vm129_vm4, %v128_v35, %v130_v36 }
 0x222   :  { %132 = vst [vmem:[%s212_s2] sm:$0xff] %v131_v37 }

</bundles_post_ra>
